<compile_context>
chip_gen: v5e
topology: v5e:2x2
jax: 0.10.0
libtpu: 0.0.40
codegen_flags: <defaults>
</compile_context>

<pallas_src>
import jax
import jax.numpy as jnp
from jax.experimental import pallas as pl
from jax.experimental.pallas import tpu as pltpu


def _round_up(n, m):
    return ((n + m - 1) // m) * m


def dis_kernel(x_ref, w1_ref, b1_ref, w2_ref, b2_ref, o_ref):
    # ----- Linear 1: (TB, X) @ (X, H) on the MXU, bf16 in / f32 accumulate.
    h = jnp.dot(x_ref[...], w1_ref[...], preferred_element_type=jnp.float32)
    h = h + b1_ref[...]                                    # (TB, H) + (1, H)
    # ----- LeakyReLU(0.2): positive slope, so max(h, 0.2*h) is exact.
    h = jnp.maximum(h, 0.2 * h)
    # ----- Linear 2 (out_features = 1): VPU multiply + lane reduce, no MXU pass.
    z = jnp.sum(h * w2_ref[...], axis=-1, keepdims=True)   # (TB, 1) f32
    z = z + b2_ref[0, 0]                                    # SMEM scalar bias
    # ----- Sigmoid: exp on the EUP, reciprocal on the EUP (approx vrcp).
    sig = pl.reciprocal(1.0 + jnp.exp(-z), approx=True)     # (TB, 1) f32
    # ----- Lane-dense store: broadcast across the 128-lane output block so the
    # store path issues full (unmasked) vst; wrapper keeps column 0 only.
    o_ref[...] = jnp.broadcast_to(sig, o_ref.shape)


def dis_forward(x, w1, b1, w2, b2, *, tb=512):
    """Dis forward.

    x : (B, X_dim);  w1: (X_dim, H_dim) (PyTorch weight pre-transposed, x @ w1);
    b1: (1, H_dim);  w2: (H_dim, 1);  b2: (1, 1).  Returns (B, 1) float32.
    """
    B, X = x.shape
    H = w1.shape[1]

    # bf16 operands for the MXU + halved x/w1 DMA traffic; activations stay f32.
    x_bf = x.astype(jnp.bfloat16)
    w1_bf = w1.astype(jnp.bfloat16)
    b1_row = b1.reshape(1, H).astype(jnp.float32)
    w2_row = w2.reshape(1, H).astype(jnp.float32)   # row layout for VPU broadcast
    b2_s = b2.reshape(1, 1).astype(jnp.float32)

    # Batch tile: multiple of 8 sublanes. At tb<=2048 and modest X_dim the
    # double-buffered bf16 x tile + resident w1 + f32 out tile stay far below the
    # ~24 MiB scoped-VMEM budget even on v7x (64 MiB physical VMEM).
    tb = max(8, min(int(tb), _round_up(B, 8)))
    tb = _round_up(tb, 8)
    b_pad = _round_up(B, tb)
    if b_pad != B:
        x_bf = jnp.pad(x_bf, ((0, b_pad - B), (0, 0)))

    grid = (b_pad // tb,)
    cost = pl.CostEstimate(
        flops=2 * b_pad * X * H + 4 * b_pad * H,
        transcendentals=2 * b_pad,
        bytes_accessed=b_pad * X * 2 + X * H * 2 + 8 * H + 4 + b_pad * 128 * 4,
    )

    out_padded = pl.pallas_call(
        dis_kernel,
        out_shape=jax.ShapeDtypeStruct((b_pad, 128), jnp.float32),
        grid_spec=pltpu.PrefetchScalarGridSpec(
            num_scalar_prefetch=0,
            grid=grid,
            in_specs=[
                pl.BlockSpec((tb, X), lambda i: (i, 0)),             # x batch tile
                pl.BlockSpec((X, H), lambda i: (0, 0)),              # w1 (resident)
                pl.BlockSpec((1, H), lambda i: (0, 0)),              # b1 row
                pl.BlockSpec((1, H), lambda i: (0, 0)),              # w2 row
                pl.BlockSpec(memory_space=pltpu.MemorySpace.SMEM),   # b2 scalar
            ],
            out_specs=pl.BlockSpec((tb, 128), lambda i: (i, 0)),
        ),
        compiler_params=pltpu.CompilerParams(
            dimension_semantics=("parallel",),
        ),
        cost_estimate=cost,
    )(x_bf, w1_bf, b1_row, w2_row, b2_s)

    return out_padded[:B, :1]


def init_params(key, x_dim, h_dim):
    """Deterministic init mimicking nn.Linear default (uniform +-1/sqrt(fan_in))."""
    k1, k2, k3, k4 = jax.random.split(key, 4)
    lim1 = 1.0 / float(x_dim) ** 0.5
    lim2 = 1.0 / float(h_dim) ** 0.5
    # w1 stored as (in, out) — i.e. already transposed vs. PyTorch's (out, in).
    w1 = jax.random.uniform(k1, (x_dim, h_dim), jnp.float32, -lim1, lim1)
    b1 = jax.random.uniform(k2, (1, h_dim), jnp.float32, -lim1, lim1)
    w2 = jax.random.uniform(k3, (h_dim, 1), jnp.float32, -lim2, lim2)
    b2 = jax.random.uniform(k4, (1, 1), jnp.float32, -lim2, lim2)
    return w1, b1, w2, b2


if __name__ == "__main__":
    # Small shapes consistent with the module: X_dim = flattened rain grid
    # (16x16 here), H_dim = 100 as in the spec, modest batch.
    B, X_DIM, H_DIM = 256, 256, 100

    key = jax.random.PRNGKey(0)
    kx, kp = jax.random.split(key)
    x = jax.random.uniform(kx, (B, X_DIM), jnp.float32)      # input.view(B, -1)
    w1, b1, w2, b2 = init_params(kp, X_DIM, H_DIM)

    out = dis_forward(x, w1, b1, w2, b2, tb=128)             # 2-step batch grid
    out = jax.block_until_ready(out)

    # Pure-JAX f32 reference; tolerance loosened for bf16 matmul + approx vrcp.
    h_ref = x @ w1 + b1
    h_ref = jnp.where(h_ref > 0, h_ref, 0.2 * h_ref)
    ref = jax.nn.sigmoid(h_ref @ w2 + b2)
    assert out.shape == (B, 1), out.shape
    err = float(jnp.max(jnp.abs(out - ref)))
    assert jnp.allclose(out, ref, atol=3e-2, rtol=3e-2), err

    print("KERNEL_OK")
</pallas_src>

<mosaic_0001>
module attributes {stable_mosaic.version = 11 : i64} {
  func.func @dis_kernel(%arg0: i32, %arg1: memref<128x256xbf16, #tpu.memory_space<vmem>>, %arg2: memref<256x100xbf16, #tpu.memory_space<vmem>>, %arg3: memref<1x100xf32, #tpu.memory_space<vmem>>, %arg4: memref<1x100xf32, #tpu.memory_space<vmem>>, %arg5: memref<1x1xf32, #tpu.memory_space<smem>>, %arg6: memref<128x128xf32, #tpu.memory_space<vmem>>) attributes {dimension_semantics = [#tpu.dimension_semantics<parallel>], iteration_bounds = array<i64: 2>, scalar_prefetch = 0 : i64, scratch_operands = 0 : i64, tpu.core_type = #tpu.core_type<tc>, window_params = [{transform_indices = @transform_0, window_bounds = array<i64: 128, 256>}, {pipeline_mode = #tpu.pipeline_mode<synchronous>, transform_indices = @transform_1, window_bounds = array<i64: 256, 100>}, {pipeline_mode = #tpu.pipeline_mode<synchronous>, transform_indices = @transform_2, window_bounds = array<i64: 1, 100>}, {pipeline_mode = #tpu.pipeline_mode<synchronous>, transform_indices = @transform_3, window_bounds = array<i64: 1, 100>}, {transform_indices = @transform_4, window_bounds = array<i64: 1, 1>}, {transform_indices = @transform_5, window_bounds = array<i64: 128, 128>}]} {
    %c0 = arith.constant 0 : index
    %c0_0 = arith.constant 0 : index
    %0 = vector.load %arg1[%c0, %c0_0] : memref<128x256xbf16, #tpu.memory_space<vmem>>, vector<128x256xbf16>
    %c0_1 = arith.constant 0 : index
    %c0_2 = arith.constant 0 : index
    %1 = vector.load %arg2[%c0_1, %c0_2] : memref<256x100xbf16, #tpu.memory_space<vmem>>, vector<256x100xbf16>
    %cst = arith.constant dense<0.000000e+00> : vector<128x100xf32>
    %2 = tpu.matmul %0, %1, %cst {dimension_numbers = #tpu.dot_dimension_numbers<[1], [0], [0], [1], [0, 0, 1, 1], [], []>} : vector<128x256xbf16>, vector<256x100xbf16>, vector<128x100xf32> -> vector<128x100xf32>
    %c0_3 = arith.constant 0 : index
    %c0_4 = arith.constant 0 : index
    %3 = vector.load %arg3[%c0_3, %c0_4] : memref<1x100xf32, #tpu.memory_space<vmem>>, vector<1x100xf32>
    %4 = vector.broadcast %3 : vector<1x100xf32> to vector<128x100xf32>
    %5 = arith.addf %2, %4 : vector<128x100xf32>
    %cst_5 = arith.constant 2.000000e-01 : f32
    %6 = vector.broadcast %cst_5 : f32 to vector<128x100xf32>
    %7 = arith.mulf %6, %5 : vector<128x100xf32>
    %8 = arith.maximumf %5, %7 : vector<128x100xf32>
    %c0_6 = arith.constant 0 : index
    %c0_7 = arith.constant 0 : index
    %9 = vector.load %arg4[%c0_6, %c0_7] : memref<1x100xf32, #tpu.memory_space<vmem>>, vector<1x100xf32>
    %10 = vector.broadcast %9 : vector<1x100xf32> to vector<128x100xf32>
    %11 = arith.mulf %8, %10 : vector<128x100xf32>
    %cst_8 = arith.constant dense<0.000000e+00> : vector<128xf32>
    %12 = vector.multi_reduction <add>, %11, %cst_8 [1] : vector<128x100xf32> to vector<128xf32>
    %13 = vector.shape_cast %12 : vector<128xf32> to vector<128x1xf32>
    %c0_9 = arith.constant 0 : index
    %c0_10 = arith.constant 0 : index
    %14 = memref.load %arg5[%c0_9, %c0_10] : memref<1x1xf32, #tpu.memory_space<smem>>
    %15 = vector.broadcast %14 : f32 to vector<128x1xf32>
    %16 = arith.addf %13, %15 : vector<128x1xf32>
    %cst_11 = arith.constant 0.000000e+00 : f32
    %17 = vector.broadcast %cst_11 : f32 to vector<128x1xf32>
    %18 = arith.subf %17, %16 : vector<128x1xf32>
    %19 = math.exp %18 : vector<128x1xf32>
    %cst_12 = arith.constant 1.000000e+00 : f32
    %20 = vector.broadcast %cst_12 : f32 to vector<128x1xf32>
    %21 = arith.addf %20, %19 : vector<128x1xf32>
    %22 = tpu.reciprocal %21 {approx = true} : vector<128x1xf32> -> vector<128x1xf32>
    %23 = vector.shape_cast %22 : vector<128x1xf32> to vector<128x1xf32>
    %24 = vector.broadcast %23 : vector<128x1xf32> to vector<128x128xf32>
    %c0_13 = arith.constant 0 : index
    %c0_14 = arith.constant 0 : index
    %25 = vector.load %arg6[%c0_13, %c0_14] : memref<128x128xf32, #tpu.memory_space<vmem>>, vector<128x128xf32>
    tpu.vector_store %arg6[%c0_13, %c0_14], %24 {strides = array<i32>} : memref<128x128xf32, #tpu.memory_space<vmem>>, vector<128x128xf32>,
    return
  }
  func.func @transform_0(%arg0: i32) -> (i32, i32) {
    %c0_i32 = arith.constant 0 : i32
    %c0_i32_0 = arith.constant 0 : i32
    return %arg0, %c0_i32 : i32, i32
  }
  func.func @transform_1(%arg0: i32) -> (i32, i32) {
    %c0_i32 = arith.constant 0 : i32
    %c0_i32_0 = arith.constant 0 : i32
    %c0_i32_1 = arith.constant 0 : i32
    return %c0_i32, %c0_i32_0 : i32, i32
  }
  func.func @transform_2(%arg0: i32) -> (i32, i32) {
    %c0_i32 = arith.constant 0 : i32
    %c0_i32_0 = arith.constant 0 : i32
    %c0_i32_1 = arith.constant 0 : i32
    return %c0_i32, %c0_i32_0 : i32, i32
  }
  func.func @transform_3(%arg0: i32) -> (i32, i32) {
    %c0_i32 = arith.constant 0 : i32
    %c0_i32_0 = arith.constant 0 : i32
    %c0_i32_1 = arith.constant 0 : i32
    return %c0_i32, %c0_i32_0 : i32, i32
  }
  func.func @transform_4(%arg0: i32) -> (i32, i32) {
    %c0_i32 = arith.constant 0 : i32
    %c0_i32_0 = arith.constant 0 : i32
    %c0_i32_1 = arith.constant 0 : i32
    return %c0_i32, %c0_i32_0 : i32, i32
  }
  func.func @transform_5(%arg0: i32) -> (i32, i32) {
    %c0_i32 = arith.constant 0 : i32
    %c0_i32_0 = arith.constant 0 : i32
    return %arg0, %c0_i32 : i32, i32
  }
}

</mosaic_0001>

<bundles_post_ra>
// kernel: tpu_custom_call.1
= control target key start
LH: loop header
LB: loop body
LE: loop exit
PB: predicated region body
PF: predicated region fallthrough
CT: control target
= control target key end

     0   :  { %s1632_s0 = inlined_call_operand.hbm [shape: bf16[256,256], index: 0, kind: input, shape index: {}]   ;;  %s1633_s1 = inlined_call_operand.vmem [shape: bf16[256,100], index: 1, kind: input, shape index: {}]   ;;  %s1634_s2 = inlined_call_operand.vmem [shape: f32[1,100], index: 2, kind: input, shape index: {}]   ;;  %s1635_s3 = inlined_call_operand.vmem [shape: f32[1,100], index: 3, kind: input, shape index: {}]   ;;  %s1636_s4 = inlined_call_operand.<no memory space> [shape: f32[1,1], index: 4, kind: input, shape index: {}]   ;;  %s1637_s5 = inlined_call_operand.hbm [shape: f32[256,128], index: 5, kind: output, shape index: {}]  }
   0x1   :  { %10 = sst [smem:[#allocation2]] %s1636_s4 }
   0x2   :  { %11 = vsyncpa [#allocation4], 0 }
   0x3   :  { %13 = vsyncpa [#allocation4 + $0x1], 0 }
   0x4   :  { %14 = vsyncpa [#allocation5], 0 }
   0x5   :  { %16 = vsyncpa [#allocation5 + $0x1], 0  ;;  %s1324_s20 = smov 0   ;;  %s1326_s21 = smov 0  }
   0x6   :  { %s1328_s22 = smov 0   ;;  %s1330_s23 = smov 0  }
   0x7 LB: > { %s1345_s4 = sadd.s32 4294967295, %s1285_s23   ;;  %s879_s24 = sadd.s32 4294967294, %s1285_s23   ;;  %s1285_s23 = sphi %s1330_s23, %s1647_s23   ;;  %s1281_s22 = sphi %s1328_s22, %s1646_s22   ;;  %s1277_s21 = sphi %s1326_s21, %s1645_s21   ;;  %s1273_s20 = sphi %s1324_s20, %s1644_s20  }
   0x8   : > { %s1349_s25 = sadd.s32 1, %s1285_s23   ;;  %s29_s26 = sadd.s32 1, %s1281_s22 }
   0x9   : > { %s26_s27 = ssub.s32 %s1285_s23, %s1349_s25  ;;  %p36_p0 = scmp.ne.s32.totalorder %s1281_s22, %s1277_s21 }
   0xa   : > { %p27_p1 = scmp.eq.s32.totalorder %s26_s27, 0  ;;  %p37_p2 = scmp.eq.s32.totalorder %s1285_s23, 0 }
   0xb   : > { %p42_p3 = scmp.ne.s32.totalorder %s1277_s21, %s1273_s20  ;;  %p43_p4 = scmp.eq.s32.totalorder %s1345_s4, 0 }
   0xc   : > { %s1361_s28 = scalar_select %p27_p1, %s1281_s22, %s29_s26  }
   0xd   : > { %p1363_p5 = por %p37_p2, %p36_p0  ;;  %p1367_p6 = por %p43_p4, %p42_p3 }
   0xe   : > { %p150_p7 = scmp.eq.s32.totalorder %s1345_s4, 1  ;;  %p156_p8 = scmp.eq.s32.totalorder %s879_s24, 1 }
   0xf   : > { %p1085_p10 = scmp.lt.s32.totalorder %s1285_s23, 2  ;;  %s188_s8 = sand.u32 1, %s1281_s22  }
  0x10   : > { %p1374_p11 = por %p150_p7, %p36_p0  ;;  %p1378_p12 = por %p156_p8, %p42_p3 }
  0x11   : > { %s1023_s9 = sshll.u32 %s1285_s23, 7  ;;  %s882_s10 = sshll.u32 %s188_s8, 7 }
  0x12   : > { %s198_s13 = scalar_lea.hbm %s1632_s0, %s1023_s9  ;;  %s192_s15 = scalar_lea.vmem [#allocation3], %s882_s10 }
  0x13   : > { %s199_s14 = sshll.u32 %s198_s13, 4  ;;  %s201_s16 = sshll.u32 %s192_s15, 4  ;;  %s200_s14 = int_to_ptr.hbm [resolvable:$true] %s199_s14  ;;  %s202_s16 = int_to_ptr.vmem [resolvable:$true] %s201_s16 }
  0x14   : > { %p1389_p13 = pnand %p1085_p10, %p1363_p5  ;;  %p886_p0 = scmp.ge.s32.totalorder %s1285_s23, 1 }
  0x15   : > { %p209_p1 = scmp.lt.s32.totalorder %s1285_s23, 3  ;;  %s189_s18 = scalar_lea.sflag [#allocation4], %s188_s8 }
  0x16   : > { %s1189_s19 = sshra.s32 %s200_s14, 4  ;;  %p1193_p3 = pneg %p1389_p13  ;;  %s1190_s19 = int_to_ptr.hbm [resolvable:$true] %s1189_s19 }
  0x17   : > { %s1191_s24 = scalar_lea.hbm %s1190_s19, 128  ;;  %s1196_s29 = scalar_lea.hbm %s1632_s0, 256 }
  0x18   : > { %p1192_p2 = scmp.ne.s32.totalorder %s1190_s19, %s1191_s24  ;;  %p1197_p5 = scmp.lt.s32.totalorder %s1190_s19, %s1632_s0 }
  0x19   : > { %p1198_p8 = scmp.lt.s32.totalorder %s1196_s29, %s1191_s24 }
  0x1a   : > { %p1194_p4 = pnand %p1193_p3, %p1192_p2 }
  0x1b   : > { %p1199_p10 = por %p1198_p8, %p1197_p5 }
  0x1c   : > { %p1195_p7 = pneg %p1194_p4 }
  0x1e   : > { %p1200_p9 = pnand %p1199_p10, %p1195_p7 }
  0x20   : > { %1203 = shalt.err (!%p1200_p9)
}
  0x21   : > { %s1287_s8 = smov 128   ;;  %s1288_s11 = smov 8  }
  0x22   : > { %1080 = dma.hbm_to_vmem [thread:$0]  (!%p1389_p13), %s200_s14, 2048, %s202_s16, %s189_s18, %s1287_s8, %s1287_s8, %s1288_s11  }
  0x23   : > { %p210_p2 = pnand %p886_p0, %p209_p1 }
  0x24   : > { %s1410_s12 = sand.u32 (!%p210_p2), 1, %s1277_s21  }
  0x25   : > { %213 = sbr.rel (%p210_p2) target bundleno = 418 (0x1a2), region = 40  ;;  %s887_s13 = sshll.u32 (!%p210_p2), %s1410_s12, 7 }
  0x26   : > { %s216_s15 = scalar_lea.sflag (!%p210_p2), [#allocation4], %s1410_s12  ;;  %s1416_s19 = scalar_lea.vmem (!%p210_p2), [#allocation3], %s887_s13 }
  0x2a   : > { %1264 = dma.done.wait (%p1367_p6), %s216_s15, 2048  }
  0x2b   : > { %1266 = vsyncadd (%p1367_p6), %s216_s15, 4294965248  ;;  %v1047_v0 = vld [vmem:[%s1633_s1 + $0x38] sm:$0xff]  ;;  %v1046_v2 = vld [vmem:[%s1633_s1 + $0x30] sm:$0xff]  ;;  %vm627_vm0 = vcmask 818176   ;;  %s676_s29 = sld [smem:[#allocation2]]  ;;  %s1569_s30 = scalar_lea.vmem [#allocation6], %s887_s13 }
  0x2c   : > { %v1055_v1 = vld [vmem:[%s1633_s1 + $0x78] sm:$0xff]  ;;  %477 = vmatpush.bf16.msra.mxu0 %v1047_v0  ;;  %1057 = vmatpush.bf16.msra.mxu2 %v1047_v0  ;;  %v1054_v3 = vld [vmem:[%s1633_s1 + $0x70] sm:$0xff]  ;;  %v1045_v4 = vld [vmem:[%s1633_s1 + $0x28] sm:$0xff]  ;;  %s1056_s13 = sshll.u32 %s1345_s4, 7  ;;  %s803_s11 = sshll.u32 %s1569_s30, 4  ;;  %s804_s11 = int_to_ptr.vmem [resolvable:$true] %s803_s11 }
  0x2d   : > { %526 = vmatpush.bf16.msra.mxu1 %v1055_v1  ;;  %1065 = vmatpush.bf16.msra.mxu3 %v1055_v1  ;;  %v1053_v5 = vld [vmem:[%s1633_s1 + $0x68] sm:$0xff]  ;;  %v1044_v6 = vld [vmem:[%s1633_s1 + $0x20] sm:$0xff]  ;;  %v1043_v8 = vld [vmem:[%s1633_s1 + $0x18] sm:$0xff]  ;;  %s802_s8 = scalar_lea.hbm %s1637_s5, %s1056_s13  ;;  %s791_s4 = scalar_lea.sflag [#allocation5], %s1410_s12 }
  0x2e   : > { %v1052_v7 = vld [vmem:[%s1633_s1 + $0x60] sm:$0xff]  ;;  %v1051_v9 = vld [vmem:[%s1633_s1 + $0x58] sm:$0xff]  ;;  %v1042_v10 = vld [vmem:[%s1633_s1 + $0x10] sm:$0xff]  ;;  %s805_s15 = sshll.u32 %s802_s8, 4  ;;  %s1239_s24 = scalar_lea.hbm %s1637_s5, 256  ;;  %s806_s15 = int_to_ptr.hbm [resolvable:$true] %s805_s15 }
  0x2f   : > { %v1050_v11 = vld [vmem:[%s1633_s1 + $0x50] sm:$0xff]  ;;  %v1041_v12 = vld [vmem:[%s1633_s1 + $0x8] sm:$0xff]  ;;  %v1040_v14 = vld [vmem:[%s1633_s1] sm:$0xff]  ;;  %s1233_s14 = sshra.s32 %s806_s15, 4  ;;  %s1234_s14 = int_to_ptr.hbm [resolvable:$true] %s1233_s14 }
  0x30   : > { %478 = vmatpush.bf16.msra.mxu0 %v1046_v2  ;;  %1058 = vmatpush.bf16.msra.mxu2 %v1046_v2  ;;  %v1049_v13 = vld [vmem:[%s1633_s1 + $0x48] sm:$0xff]  ;;  %v1048_v15 = vld [vmem:[%s1633_s1 + $0x40] sm:$0xff]  ;;  %v899_v28 = vld [vmem:[%s1416_s19 + $0x10] sm:$0xf]  ;;  %s1235_s16 = scalar_lea.hbm %s1234_s14, 128  ;;  %p1240_p0 = scmp.lt.s32.totalorder %s1234_s14, %s1637_s5 }
  0x31   : > { %527 = vmatpush.bf16.msra.mxu1 %v1054_v3  ;;  %1066 = vmatpush.bf16.msra.mxu3 %v1054_v3  ;;  %v891_v16 = vld [vmem:[%s1416_s19] sm:$0xf]  ;;  %v1025_v17 = vld [vmem:[%s1416_s19 + $0x4] sm:$0xf0]  ;;  %v1024_v20 = vld [vmem:[%s1416_s19 + $0x4] sm:$0xf]  ;;  %p1236_p6 = scmp.ne.s32.totalorder %s1234_s14, %s1235_s16  ;;  %p1241_p1 = scmp.lt.s32.totalorder %s1239_s24, %s1235_s16 }
  0x32   : > { %v923_v18 = vld [vmem:[%s1416_s19 + $0x40] sm:$0xf]  ;;  %v1033_v19 = vld [vmem:[%s1416_s19 + $0x44] sm:$0xf0]  ;;  %v893_v21 = vld [vmem:[%s1416_s19 + $0x8] sm:$0xf0]  ;;  %v892_v24 = vor.u32 %v1025_v17, %v891_v16 }
  0x33   : > { %v1032_v22 = vld [vmem:[%s1416_s19 + $0x44] sm:$0xf]  ;;  %v925_v23 = vld [vmem:[%s1416_s19 + $0x48] sm:$0xf0]  ;;  %v924_v25 = vor.u32 %v1033_v19, %v923_v18  ;;  %v896_v26 = vor.u32 %v1024_v20, %v893_v21  ;;  %v1027_v29 = vld [vmem:[%s1416_s19 + $0x14] sm:$0xf0]  ;;  %p1237_p9 = pnand %p1236_p6, %p1374_p11  ;;  %p1242_p3 = por %p1241_p1, %p1240_p0 }
  0x34   : > { %479 = vmatpush.bf16.msra.mxu0 %v1045_v4  ;;  %1059 = vmatpush.bf16.msra.mxu2 %v1045_v4  ;;  %v928_v27 = vor.u32 %v1032_v22, %v925_v23  ;;  %v931_v30 = vld [vmem:[%s1416_s19 + $0x50] sm:$0xf]  ;;  %v1035_v31 = vld [vmem:[%s1416_s19 + $0x54] sm:$0xf0]  ;;  %v1026_v32 = vld [vmem:[%s1416_s19 + $0x14] sm:$0xf]  ;;  %v900_v36 = vor.u32 %v1027_v29, %v899_v28 }
  0x35   : > { %528 = vmatpush.bf16.msra.mxu1 %v1053_v5  ;;  %1067 = vmatpush.bf16.msra.mxu3 %v1053_v5  ;;  %v901_v33 = vld [vmem:[%s1416_s19 + $0x18] sm:$0xf0]  ;;  %v1034_v34 = vld [vmem:[%s1416_s19 + $0x54] sm:$0xf]  ;;  %v932_v37 = vor.u32 %v1035_v31, %v931_v30  ;;  %v907_v40 = vld [vmem:[%s1416_s19 + $0x20] sm:$0xf]  ;;  %p1238_p13 = pneg %p1237_p9 }
  0x36   : > { %v933_v35 = vld [vmem:[%s1416_s19 + $0x58] sm:$0xf0]  ;;  %v904_v38 = vor.u32 %v1026_v32, %v901_v33  ;;  %v1029_v41 = vld [vmem:[%s1416_s19 + $0x24] sm:$0xf0]  ;;  %v939_v42 = vld [vmem:[%s1416_s19 + $0x60] sm:$0xf] }
  0x37   : > { %v936_v39 = vor.u32 %v1034_v34, %v933_v35  ;;  %v1037_v43 = vld [vmem:[%s1416_s19 + $0x64] sm:$0xf0]  ;;  %v1028_v44 = vld [vmem:[%s1416_s19 + $0x24] sm:$0xf]  ;;  %v909_v45 = vld [vmem:[%s1416_s19 + $0x28] sm:$0xf0]  ;;  %v908_v48 = vor.u32 %v1029_v41, %v907_v40  ;;  %p1243_p4 = pnand %p1242_p3, %p1238_p13 }
  0x38   : > { %480 = vmatpush.bf16.msra.mxu0 %v1044_v6  ;;  %1060 = vmatpush.bf16.msra.mxu2 %v1044_v6  ;;  %v1036_v46 = vld [vmem:[%s1416_s19 + $0x64] sm:$0xf]  ;;  %v941_v47 = vld [vmem:[%s1416_s19 + $0x68] sm:$0xf0]  ;;  %v940_v49 = vor.u32 %v1037_v43, %v939_v42  ;;  %v912_v50 = vor.u32 %v1028_v44, %v909_v45  ;;  %v915_v52 = vld [vmem:[%s1416_s19 + $0x30] sm:$0xf] }
  0x39   : > { %529 = vmatpush.bf16.msra.mxu1 %v1052_v7  ;;  %1068 = vmatpush.bf16.msra.mxu3 %v1052_v7  ;;  %v944_v51 = vor.u32 %v1036_v46, %v941_v47  ;;  %v1031_v53 = vld [vmem:[%s1416_s19 + $0x34] sm:$0xf0]  ;;  %v947_v54 = vld [vmem:[%s1416_s19 + $0x70] sm:$0xf]  ;;  %v1030_v56 = vld [vmem:[%s1416_s19 + $0x34] sm:$0xf] }
  0x3a   : > { %v1039_v55 = vld [vmem:[%s1416_s19 + $0x74] sm:$0xf0]  ;;  %v917_v57 = vld [vmem:[%s1416_s19 + $0x38] sm:$0xf0]  ;;  %v1038_v58 = vld [vmem:[%s1416_s19 + $0x74] sm:$0xf]  ;;  %v916_v60 = vor.u32 %v1031_v53, %v915_v52 }
  0x3b   : > { %v949_v59 = vld [vmem:[%s1416_s19 + $0x78] sm:$0xf0]  ;;  %v948_v61 = vor.u32 %v1039_v55, %v947_v54  ;;  %v920_v62 = vor.u32 %v1030_v56, %v917_v57  ;;  %v1505_v0 = vld [vmem:[%s1634_s2] ss:$0 sm:$0xff] }
  0x3c   : > { %481 = vmatpush.bf16.msra.mxu0 %v1043_v8  ;;  %1061 = vmatpush.bf16.msra.mxu2 %v1043_v8  ;;  %v952_v63 = vor.u32 %v1038_v58, %v949_v59  ;;  %v1511_v6 = vld [vmem:[%s1635_s3] ss:$0 sm:$0xff] }
  0x3d   : > { %530 = vmatpush.bf16.msra.mxu1 %v1051_v9  ;;  %1069 = vmatpush.bf16.msra.mxu3 %v1051_v9 }
  0x40   : > { %482 = vmatpush.bf16.msra.mxu0 %v1042_v10  ;;  %1062 = vmatpush.bf16.msra.mxu2 %v1042_v10 }
  0x41   : > { %531 = vmatpush.bf16.msra.mxu1 %v1050_v11  ;;  %1070 = vmatpush.bf16.msra.mxu3 %v1050_v11 }
  0x44   : > { %483 = vmatpush.bf16.msra.mxu0 %v1041_v12  ;;  %1063 = vmatpush.bf16.msra.mxu2 %v1041_v12 }
  0x45   : > { %532 = vmatpush.bf16.msra.mxu1 %v1049_v13  ;;  %1071 = vmatpush.bf16.msra.mxu3 %v1049_v13 }
  0x48   : > { %484 = vmatpush.bf16.msra.mxu0 %v1040_v14  ;;  %1064 = vmatpush.bf16.msra.mxu2 %v1040_v14 }
  0x49   : > { %533 = vmatpush.bf16.msra.mxu1 %v1048_v15  ;;  %1072 = vmatpush.bf16.msra.mxu3 %v1048_v15 }
  0x4b   : > { %485 = vmatmul.bf16.vlgmr.msra.gmra.mxu0 %v892_v24  ;;  %505 = vmatmul.bf16.vlgmr.msra.gmra.mxu2 %v924_v25 }
  0x4c   : > { %534 = vmatmul.bf16.vlgmr.msra.gmra.mxu1 %v896_v26  ;;  %554 = vmatmul.bf16.vlgmr.msra.gmra.mxu3 %v928_v27 }
  0x5b   : > { %490 = vmatmul.bf16.gmra.mxu0 %v900_v36  ;;  %510 = vmatmul.bf16.gmra.mxu2 %v932_v37 }
  0x5c   : > { %539 = vmatmul.bf16.gmra.mxu1 %v904_v38  ;;  %559 = vmatmul.bf16.gmra.mxu3 %v936_v39 }
  0x6b   : > { %495 = vmatmul.bf16.gmra.mxu0 %v908_v48  ;;  %515 = vmatmul.bf16.gmra.mxu2 %v940_v49 }
  0x6c   : > { %544 = vmatmul.bf16.gmra.mxu1 %v912_v50  ;;  %564 = vmatmul.bf16.gmra.mxu3 %v944_v51 }
  0x7b   : > { %500 = vmatmul.bf16.gmra.mxu0 %v916_v60  ;;  %520 = vmatmul.bf16.gmra.mxu2 %v948_v61 }
  0x7c   : > { %549 = vmatmul.bf16.gmra.mxu1 %v920_v62  ;;  %569 = vmatmul.bf16.gmra.mxu3 %v952_v63 }
  0xc8   : > { %v486_v1 = vpop.f32.mrf.mxu0 }
  0xc9   : > { %v487_v2 = vadd.f32 %v1505_v0, %v486_v1  ;;  %v535_v3 = vpop.f32.mrf.mxu1 }
  0xcb   : > { %v536_v4 = vadd.f32 %v535_v3, %v487_v2 }
  0xcd   : > { %v575_v5 = vmul.f32 0.2, %v536_v4 }
  0xce   : > { %v506_v7 = vpop.f32.mrf.mxu2 }
  0xcf   : > { %v591_v8 = vmax.f32 %v536_v4, %v575_v5  ;;  %v507_v9 = vadd.f32 %v1505_v0, %v506_v7  ;;  %v555_v10 = vpop.f32.mrf.mxu3 }
  0xd0   : > { %v488_v11 = vpop.f32.mrf.mxu0 }
  0xd1   : > { %v556_v12 = vadd.f32 %v555_v10, %v507_v9  ;;  %v489_v13 = vadd.f32 %v1505_v0, %v488_v11  ;;  %v537_v14 = vpop.f32.mrf.mxu1  ;;  %v611_v15 = vmul.f32 %v1511_v6, %v591_v8 }
  0xd3   : > { %v583_v16 = vmul.f32 0.2, %v556_v12  ;;  %v538_v17 = vadd.f32 %v537_v14, %v489_v13  ;;  %v628_v18 = vsel %vm627_vm0, %v611_v15, 0.0 }
  0xd4   : > { %629 = vadd.xlane.f32.xlu0 %v628_v18 }
  0xd5   : > { %v599_v19 = vmax.f32 %v556_v12, %v583_v16  ;;  %v576_v20 = vmul.f32 0.2, %v538_v17 }
  0xd6   : > { %v508_v21 = vpop.f32.mrf.mxu2 }
  0xd7   : > { %v592_v22 = vmax.f32 %v538_v17, %v576_v20  ;;  %v509_v23 = vadd.f32 %v1505_v0, %v508_v21  ;;  %v557_v24 = vpop.f32.mrf.mxu3  ;;  %v619_v25 = vmul.f32 %v1511_v6, %v599_v19 }
  0xd8   : > { %v491_v26 = vpop.f32.mrf.mxu0 }
  0xd9   : > { %v558_v27 = vadd.f32 %v557_v24, %v509_v23  ;;  %v492_v28 = vadd.f32 %v1505_v0, %v491_v26  ;;  %v540_v29 = vpop.f32.mrf.mxu1  ;;  %v652_v30 = vsel %vm627_vm0, %v619_v25, 0.0  ;;  %v612_v31 = vmul.f32 %v1511_v6, %v592_v22 }
  0xda   : > { %653 = vadd.xlane.f32.xlu2 %v652_v30 }
  0xdb   : > { %v584_v32 = vmul.f32 0.2, %v558_v27  ;;  %v541_v33 = vadd.f32 %v540_v29, %v492_v28  ;;  %v631_v34 = vsel %vm627_vm0, %v612_v31, 0.0 }
  0xdc   : > { %632 = vadd.xlane.f32.xlu0 %v631_v34 }
  0xdd   : > { %v600_v35 = vmax.f32 %v558_v27, %v584_v32  ;;  %v577_v36 = vmul.f32 0.2, %v541_v33 }
  0xde   : > { %v511_v37 = vpop.f32.mrf.mxu2 }
  0xdf   : > { %v593_v38 = vmax.f32 %v541_v33, %v577_v36  ;;  %v512_v39 = vadd.f32 %v1505_v0, %v511_v37  ;;  %v560_v40 = vpop.f32.mrf.mxu3  ;;  %v620_v41 = vmul.f32 %v1511_v6, %v600_v35 }
  0xe0   : > { %v493_v42 = vpop.f32.mrf.mxu0 }
  0xe1   : > { %v561_v43 = vadd.f32 %v560_v40, %v512_v39  ;;  %v494_v44 = vadd.f32 %v1505_v0, %v493_v42  ;;  %v542_v45 = vpop.f32.mrf.mxu1  ;;  %v613_v46 = vmul.f32 %v1511_v6, %v593_v38  ;;  %v655_v50 = vsel %vm627_vm0, %v620_v41, 0.0 }
  0xe3   : > { %v585_v47 = vmul.f32 0.2, %v561_v43  ;;  %v543_v48 = vadd.f32 %v542_v45, %v494_v44  ;;  %v634_v49 = vsel %vm627_vm0, %v613_v46, 0.0 }
  0xe4   : > { %635 = vadd.xlane.f32.xlu1 %v634_v49  ;;  %656 = vadd.xlane.f32.xlu0 %v655_v50 }
  0xe5   : > { %v601_v51 = vmax.f32 %v561_v43, %v585_v47  ;;  %v578_v53 = vmul.f32 0.2, %v543_v48 }
  0xe6   : > { %v513_v52 = vpop.f32.mrf.mxu2 }
  0xe7   : > { %v514_v54 = vadd.f32 %v1505_v0, %v513_v52  ;;  %v562_v55 = vpop.f32.mrf.mxu3  ;;  %v621_v56 = vmul.f32 %v1511_v6, %v601_v51  ;;  %v594_v61 = vmax.f32 %v543_v48, %v578_v53 }
  0xe8   : > { %v496_v57 = vpop.f32.mrf.mxu0 }
  0xe9   : > { %v563_v58 = vadd.f32 %v562_v55, %v514_v54  ;;  %v497_v59 = vadd.f32 %v1505_v0, %v496_v57  ;;  %v545_v60 = vpop.f32.mrf.mxu1  ;;  %v658_v1 = vsel %vm627_vm0, %v621_v56, 0.0  ;;  %v614_v9 = vmul.f32 %v1511_v6, %v594_v61 }
  0xeb   : > { %v586_v62 = vmul.f32 0.2, %v563_v58  ;;  %v546_v63 = vadd.f32 %v545_v60, %v497_v59  ;;  %v637_v18 = vsel %vm627_vm0, %v614_v9, 0.0 }
  0xec   : > { %659 = vadd.xlane.f32.xlu1 %v658_v1 }
  0xed   : > { %v602_v2 = vmax.f32 %v563_v58, %v586_v62  ;;  %v579_v3 = vmul.f32 0.2, %v546_v63 }
  0xee   : > { %v516_v4 = vpop.f32.mrf.mxu2 }
  0xef   : > { %v517_v5 = vadd.f32 %v1505_v0, %v516_v4  ;;  %v565_v7 = vpop.f32.mrf.mxu3  ;;  %v622_v8 = vmul.f32 %v1511_v6, %v602_v2  ;;  %v595_v11 = vmax.f32 %v546_v63, %v579_v3 }
  0xf0   : > { %v498_v10 = vpop.f32.mrf.mxu0 }
  0xf1   : > { %v566_v12 = vadd.f32 %v565_v7, %v517_v5  ;;  %v499_v13 = vadd.f32 %v1505_v0, %v498_v10  ;;  %v547_v14 = vpop.f32.mrf.mxu1  ;;  %v661_v15 = vsel %vm627_vm0, %v622_v8, 0.0  ;;  %v615_v21 = vmul.f32 %v1511_v6, %v595_v11 }
  0xf2   : > { %662 = vadd.xlane.f32.xlu2 %v661_v15 }
  0xf3   : > { %v587_v16 = vmul.f32 0.2, %v566_v12  ;;  %v548_v17 = vadd.f32 %v547_v14, %v499_v13  ;;  %v640_v31 = vsel %vm627_vm0, %v615_v21, 0.0 }
  0xf4   : > { %638 = vadd.xlane.f32.xlu1 %v637_v18 }
  0xf5   : > { %v603_v19 = vmax.f32 %v566_v12, %v587_v16  ;;  %v580_v20 = vmul.f32 0.2, %v548_v17 }
  0xf6   : > { %v518_v22 = vpop.f32.mrf.mxu2 }
  0xf7   : > { %v519_v23 = vadd.f32 %v1505_v0, %v518_v22  ;;  %v567_v24 = vpop.f32.mrf.mxu3  ;;  %v623_v25 = vmul.f32 %v1511_v6, %v603_v19  ;;  %v596_v26 = vmax.f32 %v548_v17, %v580_v20 }
  0xf8   : > { %v501_v27 = vpop.f32.mrf.mxu0 }
  0xf9   : > { %v568_v28 = vadd.f32 %v567_v24, %v519_v23  ;;  %v502_v29 = vadd.f32 %v1505_v0, %v501_v27  ;;  %v550_v30 = vpop.f32.mrf.mxu1  ;;  %v664_v32 = vsel %vm627_vm0, %v623_v25, 0.0  ;;  %v616_v35 = vmul.f32 %v1511_v6, %v596_v26 }
  0xfa   : > { %641 = vadd.xlane.f32.xlu2 %v640_v31  ;;  %665 = vadd.xlane.f32.xlu0 %v664_v32 }
  0xfb   : > { %v588_v33 = vmul.f32 0.2, %v568_v28  ;;  %v551_v34 = vadd.f32 %v550_v30, %v502_v29  ;;  %v643_v44 = vsel %vm627_vm0, %v616_v35, 0.0 }
  0xfd   : > { %v604_v36 = vmax.f32 %v568_v28, %v588_v33  ;;  %v581_v37 = vmul.f32 0.2, %v551_v34 }
  0xfe   : > { %v521_v38 = vpop.f32.mrf.mxu2 }
  0xff   : > { %v597_v39 = vmax.f32 %v551_v34, %v581_v37  ;;  %v522_v40 = vadd.f32 %v1505_v0, %v521_v38  ;;  %v570_v41 = vpop.f32.mrf.mxu3  ;;  %v624_v42 = vmul.f32 %v1511_v6, %v604_v36 }
 0x100   : > { %v503_v43 = vpop.f32.mrf.mxu0 }
 0x101   : > { %v571_v45 = vadd.f32 %v570_v41, %v522_v40  ;;  %v504_v46 = vadd.f32 %v1505_v0, %v503_v43  ;;  %v617_v47 = vmul.f32 %v1511_v6, %v597_v39  ;;  %v667_v48 = vsel %vm627_vm0, %v624_v42, 0.0  ;;  %v552_v49 = vpop.f32.mrf.mxu1 }
 0x102   : > { %644 = vadd.xlane.f32.xlu2 %v643_v44 }
 0x103   : > { %v589_v50 = vmul.f32 0.2, %v571_v45  ;;  %v553_v51 = vadd.f32 %v552_v49, %v504_v46  ;;  %v646_v52 = vsel %vm627_vm0, %v617_v47, 0.0 }
 0x104   : > { %647 = vadd.xlane.f32.xlu0 %v646_v52 }
 0x105   : > { %v605_v53 = vmax.f32 %v571_v45, %v589_v50  ;;  %v582_v54 = vmul.f32 0.2, %v553_v51 }
 0x106   : > { %v523_v55 = vpop.f32.mrf.mxu2 }
 0x107   : > { %v598_v56 = vmax.f32 %v553_v51, %v582_v54  ;;  %v524_v57 = vadd.f32 %v1505_v0, %v523_v55  ;;  %v625_v58 = vmul.f32 %v1511_v6, %v605_v53  ;;  %v572_v59 = vpop.f32.mrf.mxu3  ;;  %v1560_v0 = vstv %s676_s29 }
 0x109   : > { %v573_v60 = vadd.f32 %v572_v59, %v524_v57  ;;  %v670_v61 = vsel %vm627_vm0, %v625_v58, 0.0  ;;  %v618_v62 = vmul.f32 %v1511_v6, %v598_v56 }
 0x10a   : > { %671 = vadd.xlane.f32.xlu2 %v670_v61 }
 0x10b   : > { %v590_v63 = vmul.f32 0.2, %v573_v60  ;;  %v649_v1 = vsel %vm627_vm0, %v618_v62, 0.0 }
 0x10c   : > { %650 = vadd.xlane.f32.xlu1 %v649_v1 }
 0x10d   : > { %v606_v2 = vmax.f32 %v573_v60, %v590_v63 }
 0x10f   : > { %v626_v3 = vmul.f32 %v1511_v6, %v606_v2 }
 0x111   : > { %v673_v4 = vsel %vm627_vm0, %v626_v3, 0.0 }
 0x112   : > { %674 = vadd.xlane.f32.xlu0 %v673_v4 }
 0x114   : > { %668 = vadd.xlane.f32.xlu1 %v667_v48 }
 0x147   : > { %v630_v5 = vpop.xlane.xlu0 %629 }
 0x148   : > { %v678_v7 = vadd.f32 %v1560_v0, %v630_v5 }
 0x14a   : > { %v694_v8 = vsub.f32 0.0, %v678_v7 }
 0x14c   : > { %v710_v9 = vmul.f32 1.442695, %v694_v8 }
 0x14d   : > { %v654_v10 = vpop.xlane.xlu2 %653 }
 0x14e   : > { %1125 = vpow2.f32 %v710_v9  ;;  %v686_v11 = vadd.f32 %v1560_v0, %v654_v10 }
 0x14f   : > { %v633_v12 = vpop.xlane.xlu0 %632 }
 0x150   : > { %v702_v13 = vsub.f32 0.0, %v686_v11  ;;  %v679_v6 = vadd.f32 %v1560_v0, %v633_v12 }
 0x152   : > { %v726_v14 = vmul.f32 1.442695, %v702_v13  ;;  %v695_v15 = vsub.f32 0.0, %v679_v6 }
 0x154   : > { %v1126_v16 = vpop.eup %1125  ;;  %1127 = vpow2.f32 %v726_v14  ;;  %v712_v17 = vmul.f32 1.442695, %v695_v15 }
 0x155   : > { %v742_v18 = vadd.f32 1.0, %v1126_v16 }
 0x156   : > { %1129 = vpow2.f32 %v712_v17 }
 0x157   : > { %1131 = vrcp.f32 %v742_v18  ;;  %v636_v19 = vpop.xlane.xlu1 %635  ;;  %v657_v20 = vpop.xlane.xlu0 %656 }
 0x158   : > { %v680_v21 = vadd.f32 %v1560_v0, %v636_v19  ;;  %v687_v22 = vadd.f32 %v1560_v0, %v657_v20 }
 0x15a   : > { %v1128_v23 = vpop.eup %1127  ;;  %v696_v24 = vsub.f32 0.0, %v680_v21  ;;  %v703_v25 = vsub.f32 0.0, %v687_v22 }
 0x15b   : > { %v750_v26 = vadd.f32 1.0, %v1128_v23 }
 0x15c   : > { %v1130_v27 = vpop.eup %1129  ;;  %v714_v28 = vmul.f32 1.442695, %v696_v24  ;;  %v728_v29 = vmul.f32 1.442695, %v703_v25 }
 0x15d   : > { %v1132_v30 = vpop.eup %1131  ;;  %1133 = vrcp.f32 %v750_v26  ;;  %v743_v31 = vadd.f32 1.0, %v1130_v27 }
 0x15e   : > { %774 = vst [vmem:[%s1569_s30] sm:$0xff] %v1132_v30  ;;  %1135 = vpow2.f32 %v714_v28 }
 0x15f   : > { %1137 = vrcp.f32 %v743_v31  ;;  %v660_v32 = vpop.xlane.xlu1 %659 }
 0x160   : > { %1139 = vpow2.f32 %v728_v29  ;;  %v688_v33 = vadd.f32 %v1560_v0, %v660_v32 }
 0x162   : > { %v704_v34 = vsub.f32 0.0, %v688_v33 }
 0x163   : > { %v1134_v35 = vpop.eup %1133 }
 0x164   : > { %v1136_v36 = vpop.eup %1135  ;;  %782 = vst [vmem:[%s1569_s30 + $0x40] sm:$0xff] %v1134_v35  ;;  %v730_v37 = vmul.f32 1.442695, %v704_v34 }
 0x165   : > { %v1138_v38 = vpop.eup %1137  ;;  %v744_v39 = vadd.f32 1.0, %v1136_v36  ;;  %v663_v40 = vpop.xlane.xlu2 %662 }
 0x166   : > { %v1140_v41 = vpop.eup %1139  ;;  %775 = vst [vmem:[%s1569_s30 + $0x8] sm:$0xff] %v1138_v38  ;;  %1141 = vpow2.f32 %v730_v37  ;;  %v689_v42 = vadd.f32 %v1560_v0, %v663_v40 }
 0x167   : > { %1143 = vrcp.f32 %v744_v39  ;;  %v751_v43 = vadd.f32 1.0, %v1140_v41  ;;  %v639_v44 = vpop.xlane.xlu1 %638 }
 0x168   : > { %v705_v45 = vsub.f32 0.0, %v689_v42  ;;  %v681_v46 = vadd.f32 %v1560_v0, %v639_v44 }
 0x169   : > { %1145 = vrcp.f32 %v751_v43 }
 0x16a   : > { %v732_v47 = vmul.f32 1.442695, %v705_v45  ;;  %v697_v48 = vsub.f32 0.0, %v681_v46 }
 0x16c   : > { %v1142_v49 = vpop.eup %1141  ;;  %1147 = vpow2.f32 %v732_v47  ;;  %v716_v50 = vmul.f32 1.442695, %v697_v48 }
 0x16d   : > { %v1144_v51 = vpop.eup %1143  ;;  %v752_v52 = vadd.f32 1.0, %v1142_v49  ;;  %v642_v53 = vpop.xlane.xlu2 %641 }
 0x16e   : > { %v666_v54 = vpop.xlane.xlu0 %665  ;;  %776 = vst [vmem:[%s1569_s30 + $0x10] sm:$0xff] %v1144_v51  ;;  %1149 = vpow2.f32 %v716_v50  ;;  %v682_v55 = vadd.f32 %v1560_v0, %v642_v53 }
 0x16f   : > { %v690_v56 = vadd.f32 %v1560_v0, %v666_v54  ;;  %v1146_v57 = vpop.eup %1145  ;;  %1151 = vrcp.f32 %v752_v52 }
 0x170   : > { %783 = vst [vmem:[%s1569_s30 + $0x48] sm:$0xff] %v1146_v57  ;;  %v698_v58 = vsub.f32 0.0, %v682_v55 }
 0x171   : > { %v706_v59 = vsub.f32 0.0, %v690_v56 }
 0x172   : > { %v1148_v60 = vpop.eup %1147  ;;  %v718_v61 = vmul.f32 1.442695, %v698_v58 }
 0x173   : > { %v734_v62 = vmul.f32 1.442695, %v706_v59  ;;  %v753_v63 = vadd.f32 1.0, %v1148_v60 }
 0x174   : > { %v1150_v1 = vpop.eup %1149  ;;  %1153 = vpow2.f32 %v718_v61 }
 0x175   : > { %v1152_v2 = vpop.eup %1151  ;;  %1155 = vrcp.f32 %v753_v63  ;;  %v745_v3 = vadd.f32 1.0, %v1150_v1  ;;  %v645_v4 = vpop.xlane.xlu2 %644 }
 0x176   : > { %784 = vst [vmem:[%s1569_s30 + $0x50] sm:$0xff] %v1152_v2  ;;  %1157 = vpow2.f32 %v734_v62  ;;  %v683_v5 = vadd.f32 %v1560_v0, %v645_v4 }
 0x177   : > { %1159 = vrcp.f32 %v745_v3  ;;  %v648_v7 = vpop.xlane.xlu0 %647 }
 0x178   : > { %v699_v8 = vsub.f32 0.0, %v683_v5  ;;  %v684_v9 = vadd.f32 %v1560_v0, %v648_v7 }
 0x17a   : > { %v1154_v10 = vpop.eup %1153  ;;  %v720_v11 = vmul.f32 1.442695, %v699_v8  ;;  %v700_v12 = vsub.f32 0.0, %v684_v9 }
 0x17b   : > { %v1156_v13 = vpop.eup %1155  ;;  %v746_v6 = vadd.f32 1.0, %v1154_v10 }
 0x17c   : > { %v1158_v14 = vpop.eup %1157  ;;  %785 = vst [vmem:[%s1569_s30 + $0x58] sm:$0xff] %v1156_v13  ;;  %1161 = vpow2.f32 %v720_v11  ;;  %v722_v15 = vmul.f32 1.442695, %v700_v12 }
 0x17d   : > { %v1160_v16 = vpop.eup %1159  ;;  %1163 = vrcp.f32 %v746_v6  ;;  %v754_v17 = vadd.f32 1.0, %v1158_v14  ;;  %v672_v18 = vpop.xlane.xlu2 %671 }
 0x17e   : > { %777 = vst [vmem:[%s1569_s30 + $0x18] sm:$0xff] %v1160_v16  ;;  %1165 = vpow2.f32 %v722_v15  ;;  %v692_v19 = vadd.f32 %v1560_v0, %v672_v18 }
 0x17f   : > { %1167 = vrcp.f32 %v754_v17  ;;  %v651_v20 = vpop.xlane.xlu1 %650 }
 0x180   : > { %v708_v21 = vsub.f32 0.0, %v692_v19  ;;  %v685_v22 = vadd.f32 %v1560_v0, %v651_v20 }
 0x182   : > { %v1162_v23 = vpop.eup %1161  ;;  %v738_v24 = vmul.f32 1.442695, %v708_v21  ;;  %v701_v25 = vsub.f32 0.0, %v685_v22 }
 0x183   : > { %v1164_v26 = vpop.eup %1163  ;;  %v747_v27 = vadd.f32 1.0, %v1162_v23 }
 0x184   : > { %v1166_v28 = vpop.eup %1165  ;;  %778 = vst [vmem:[%s1569_s30 + $0x20] sm:$0xff] %v1164_v26  ;;  %1169 = vpow2.f32 %v738_v24  ;;  %v724_v29 = vmul.f32 1.442695, %v701_v25 }
 0x185   : > { %v1168_v30 = vpop.eup %1167  ;;  %1171 = vrcp.f32 %v747_v27  ;;  %v748_v31 = vadd.f32 1.0, %v1166_v28  ;;  %v675_v32 = vpop.xlane.xlu0 %674 }
 0x186   : > { %786 = vst [vmem:[%s1569_s30 + $0x60] sm:$0xff] %v1168_v30  ;;  %1173 = vpow2.f32 %v724_v29  ;;  %v693_v33 = vadd.f32 %v1560_v0, %v675_v32 }
 0x187   : > { %1175 = vrcp.f32 %v748_v31  ;;  %v669_v34 = vpop.xlane.xlu1 %668 }
 0x188   : > { %v709_v35 = vsub.f32 0.0, %v693_v33  ;;  %v691_v36 = vadd.f32 %v1560_v0, %v669_v34 }
 0x18a   : > { %v1170_v37 = vpop.eup %1169  ;;  %v740_v38 = vmul.f32 1.442695, %v709_v35  ;;  %v707_v39 = vsub.f32 0.0, %v691_v36 }
 0x18b   : > { %v1172_v40 = vpop.eup %1171  ;;  %v756_v41 = vadd.f32 1.0, %v1170_v37 }
 0x18c   : > { %v1174_v42 = vpop.eup %1173  ;;  %779 = vst [vmem:[%s1569_s30 + $0x28] sm:$0xff] %v1172_v40  ;;  %1177 = vpow2.f32 %v740_v38  ;;  %v736_v43 = vmul.f32 1.442695, %v707_v39 }
 0x18d   : > { %v1176_v44 = vpop.eup %1175  ;;  %1179 = vrcp.f32 %v756_v41  ;;  %v749_v45 = vadd.f32 1.0, %v1174_v42 }
 0x18e   : > { %780 = vst [vmem:[%s1569_s30 + $0x30] sm:$0xff] %v1176_v44  ;;  %1181 = vpow2.f32 %v736_v43 }
 0x18f   : > { %1183 = vrcp.f32 %v749_v45 }
 0x192   : > { %v1178_v0 = vpop.eup %1177 }
 0x193   : > { %v1180_v46 = vpop.eup %1179  ;;  %v757_v47 = vadd.f32 1.0, %v1178_v0 }
 0x194   : > { %v1182_v48 = vpop.eup %1181  ;;  %788 = vst [vmem:[%s1569_s30 + $0x70] sm:$0xff] %v1180_v46 }
 0x195   : > { %v1184_v49 = vpop.eup %1183  ;;  %1185 = vrcp.f32 %v757_v47  ;;  %v755_v50 = vadd.f32 1.0, %v1182_v48 }
 0x196   : > { %781 = vst [vmem:[%s1569_s30 + $0x38] sm:$0xff] %v1184_v49 }
 0x197   : > { %1187 = vrcp.f32 %v755_v50 }
 0x19b   : > { %v1186_v51 = vpop.eup %1185 }
 0x19c   : > { %789 = vst [vmem:[%s1569_s30 + $0x78] sm:$0xff] %v1186_v51 }
 0x19d   : > { %v1188_v52 = vpop.eup %1187 }
 0x19e   : > { %787 = vst [vmem:[%s1569_s30 + $0x68] sm:$0xff] %v1188_v52 }
 0x19f   : > { %1246 = shalt.err (!%p1243_p4)
}
 0x1a0   : > { %s1289_s12 = smov 128   ;;  %s1290_s27 = smov 8  }
 0x1a1   : > { %1075 = dma.vmem_to_hbm [thread:$0]  (%p1374_p11), %s804_s11, 2048, %s806_s15, %s791_s4, %s1289_s12, %s1289_s12, %s1290_s27  }
 0x1a2 PF: > { %s820_s29 = sand.u32 1, %s1273_s20   ;;  %p1643_p7 = scmp.ge.s32.totalorder %s1285_s23, 2 }
 0x1a3   : > { %s821_s30 = scalar_lea.sflag [#allocation5], %s820_s29 }
 0x1a4   : > { %p1082_p5 = pnand %p1643_p7, %p1378_p12 }
 0x1a6   : > { %p1083_p8 = pneg %p1082_p5 }
 0x1a8   : > { %1268 = dma.done.wait (%p1083_p8), %s821_s30, 2048  }
 0x1a9   : > { %1270 = vsyncadd (%p1083_p8), %s821_s30, 4294965248  ;;  %p19_p10 = scmp.ge.s32.totalorder %s1349_s25, 4   ;;  %s1644_s20 = smov %s1277_s21 }
 0x1aa   : > { %s1645_s21 = smov %s1281_s22  ;;  %s1646_s22 = smov %s1361_s28 }
 0x1ab   : > { %s1647_s23 = smov %s1349_s25  ;;  %21 = sbr.rel (!%p19_p10) target bundleno = 7 (0x7), region = 85 }
 0x1b0   :  { %827 = vsyncpa [#allocation4], 1 }
 0x1b1   :  { %829 = vsyncpa [#allocation4 + $0x1], 1 }
 0x1b2   :  { %830 = vsyncpa [#allocation5], 1 }
 0x1b3   :  { %832 = vsyncpa [#allocation5 + $0x1], 1 }

</bundles_post_ra>
